<compile_context>
chip_gen: v5e
topology: v5e:2x2
jax: 0.10.0
libtpu: 0.0.40
codegen_flags: <defaults>
</compile_context>

<pallas_src>
import functools
import numpy as np

import jax
import jax.numpy as jnp
from jax import lax
from jax.experimental import pallas as pl
from jax.experimental.pallas import tpu as pltpu


# ----------------------------------------------------------------------------- kernels
def _pos_enc_eval_kernel(x_ref, pe_ref, o_ref):
    # x_ref: (ts, B, D), pe_ref: (ts, D), o_ref: (ts, B, D) -- all VMEM.
    o_ref[...] = x_ref[...] + pe_ref[...][:, None, :]


def _hash_u32(x):
    # lowbias32-style avalanche hash: xor / logical-shift / wrapping-mul only.
    x = (x ^ (x >> 16)) * np.uint32(0x7FEB352D)
    x = (x ^ (x >> 15)) * np.uint32(0x846CA68B)
    x = x ^ (x >> 16)
    return x


def _pos_enc_train_kernel(seed_ref, x_ref, pe_ref, o_ref, *, dropout_p: float):
    y = x_ref[...] + pe_ref[...][:, None, :]

    # Counter-based RNG: hash(linear element index ^ (seed, tile) mix).  Pure integer
    # VPU ops -> lowers on TPU Mosaic and in interpret mode (no pltpu.prng_*).
    shape = y.shape                                   # (ts, B, D), static
    i0 = lax.broadcasted_iota(jnp.int32, shape, 0)
    i1 = lax.broadcasted_iota(jnp.int32, shape, 1)
    i2 = lax.broadcasted_iota(jnp.int32, shape, 2)
    lin = (i0 * (shape[1] * shape[2]) + i1 * shape[2] + i2).astype(jnp.uint32)

    base = (seed_ref[0].astype(jnp.uint32) * np.uint32(0x9E3779B1)
            + pl.program_id(0).astype(jnp.uint32) * np.uint32(0x85EBCA77))
    bits = _hash_u32(lin ^ base)
    r31 = (bits >> 1).astype(jnp.int32)               # 31 uniform random bits, >= 0

    # drop with probability p  <=>  r31 < p * 2^31 ; keep otherwise (inverted dropout).
    thresh = jnp.int32(min(2 ** 31 - 1, int(dropout_p * (2 ** 31))))
    keep = r31 >= thresh
    scale = jnp.asarray(1.0 / (1.0 - dropout_p), dtype=y.dtype)
    o_ref[...] = jnp.where(keep, y * scale, jnp.zeros_like(y))


# ------------------------------------------------------------------------------- setup
def make_positional_encoding_table(d_model: int, max_len: int = 5000,
                                   dtype=jnp.float32) -> jnp.ndarray:
    """Deterministic PE buffer, identical math to the PyTorch __init__."""
    position = np.arange(0, max_len, dtype=np.float32)[:, None]
    div_term = np.exp(np.arange(0, d_model, 2, dtype=np.float32)
                      * (-np.log(10000.0) / d_model))
    pe = np.zeros((max_len, d_model), dtype=np.float32)
    pe[:, 0::2] = np.sin(position * div_term)
    pe[:, 1::2] = np.cos(position * div_term)
    # PyTorch stores (max_len, 1, d_model); we keep (max_len, d_model) and broadcast
    # the singleton batch dim inside the kernel.
    return jnp.asarray(pe, dtype=dtype)


def _pick_seq_tile(S: int, B: int, D: int, itemsize: int,
                   budget_bytes: int = 2 * 1024 * 1024) -> int:
    """Largest seq-tile whose x-block stays near budget_bytes; keeps ts a multiple of 8
    (pe-block sublane rule) whenever S itself allows it."""
    rows = max(1, budget_bytes // max(1, B * D * itemsize))
    ts = min(S, max(8, rows))
    if ts >= 8:
        ts -= ts % 8
    return max(1, ts)


# ----------------------------------------------------------------------------- wrapper
def positional_encoding(x: jnp.ndarray,
                        pe_table: jnp.ndarray,
                        *,
                        train: bool = False,
                        dropout_p: float = 0.1,
                        seed: int = 0) -> jnp.ndarray:
    """x: (seq_len, batch, d_model). Returns dropout(x + pe[:seq_len]) (eval: identity dropout)."""
    S, B, D = x.shape
    max_len = pe_table.shape[0]
    assert S <= max_len, "sequence longer than positional-encoding table"
    if pe_table.dtype != x.dtype:
        # One-time cast; prefer constructing the table at x.dtype.
        pe_table = pe_table.astype(x.dtype)

    itemsize = jnp.dtype(x.dtype).itemsize
    ts = _pick_seq_tile(S, B, D, itemsize)
    if ts % 8 != 0 and ts != pe_table.shape[0]:
        # Degenerate S < 8 case: make the pe block equal to its full (sliced) extent so
        # the 2-D (ts, D) block satisfies the sublane rule.
        pe_table = pe_table[:S]
    grid = (pl.cdiv(S, ts),)

    x_spec = pl.BlockSpec((ts, B, D), lambda i: (i, 0, 0))
    pe_spec = pl.BlockSpec((ts, D), lambda i: (i, 0))     # slices the FULL table per tile
    out_spec = pl.BlockSpec((ts, B, D), lambda i: (i, 0, 0))

    compiler_params = pltpu.CompilerParams(
        dimension_semantics=("parallel",),                # v7x: shard grid across both TCs
        vmem_limit_bytes=32 * 1024 * 1024,                # explicit, safe on v5e/v6e/v7x
    )
    out_shape = jax.ShapeDtypeStruct((S, B, D), x.dtype)

    if train and dropout_p > 0.0:
        kernel = functools.partial(_pos_enc_train_kernel, dropout_p=float(dropout_p))
        seed_arr = jnp.asarray([seed], dtype=jnp.int32)
        return pl.pallas_call(
            kernel,
            out_shape=out_shape,
            grid=grid,
            in_specs=[
                pl.BlockSpec(memory_space=pltpu.MemorySpace.SMEM),  # seed scalar
                x_spec,
                pe_spec,
            ],
            out_specs=out_spec,
            compiler_params=compiler_params,
        )(seed_arr, x, pe_table)

    # Eval path: no seed argument at all.
    return pl.pallas_call(
        _pos_enc_eval_kernel,
        out_shape=out_shape,
        grid=grid,
        in_specs=[x_spec, pe_spec],
        out_specs=out_spec,
        compiler_params=compiler_params,
    )(x, pe_table)


# -------------------------------------------------------------------------------- test
if __name__ == "__main__":
    key = jax.random.PRNGKey(0)
    seq_len, batch, d_model = 8, 2, 32
    max_len = 64

    x = jax.random.normal(key, (seq_len, batch, d_model), dtype=jnp.float32)
    pe_table = make_positional_encoding_table(d_model, max_len=max_len, dtype=jnp.float32)

    # Eval-mode forward (dropout is identity, like module.eval() in PyTorch).
    out = jax.block_until_ready(positional_encoding(x, pe_table, train=False))
    ref = np.asarray(x) + np.asarray(pe_table)[:seq_len][:, None, :]
    np.testing.assert_allclose(np.asarray(out), ref, rtol=1e-6, atol=1e-6)

    # Train-mode smoke + sanity check: kept elements are exactly (x+pe)/(1-p),
    # and the dropped fraction is plausible for p=0.1.
    p = 0.1
    out_tr = jax.block_until_ready(
        positional_encoding(x, pe_table, train=True, dropout_p=p, seed=123))
    out_tr = np.asarray(out_tr)
    kept = out_tr != 0.0
    assert kept.any(), "dropout dropped everything"
    np.testing.assert_allclose(out_tr[kept], (ref / (1.0 - p))[kept], rtol=1e-5, atol=1e-5)
    drop_frac = 1.0 - kept.mean()
    assert 0.0 < drop_frac < 0.4, f"unexpected dropout fraction {drop_frac}"

    print("KERNEL_OK")
</pallas_src>

<mosaic_0001>
module attributes {stable_mosaic.version = 11 : i64} {
  func.func @_pos_enc_eval_kernel(%arg0: i32, %arg1: memref<8x2x32xf32, #tpu.memory_space<vmem>>, %arg2: memref<8x32xf32, #tpu.memory_space<vmem>>, %arg3: memref<8x2x32xf32, #tpu.memory_space<vmem>>) attributes {dimension_semantics = [#tpu.dimension_semantics<parallel>], iteration_bounds = array<i64: 1>, scalar_prefetch = 0 : i64, scratch_operands = 0 : i64, tpu.core_type = #tpu.core_type<tc>, window_params = [{transform_indices = @transform_0, window_bounds = array<i64: 8, 2, 32>}, {transform_indices = @transform_1, window_bounds = array<i64: 8, 32>}, {transform_indices = @transform_2, window_bounds = array<i64: 8, 2, 32>}]} {
    %c0 = arith.constant 0 : index
    %c0_0 = arith.constant 0 : index
    %c0_1 = arith.constant 0 : index
    %0 = vector.load %arg1[%c0, %c0_0, %c0_1] : memref<8x2x32xf32, #tpu.memory_space<vmem>>, vector<8x2x32xf32>
    %c0_2 = arith.constant 0 : index
    %c0_3 = arith.constant 0 : index
    %1 = vector.load %arg2[%c0_2, %c0_3] : memref<8x32xf32, #tpu.memory_space<vmem>>, vector<8x32xf32>
    %2 = vector.shape_cast %1 : vector<8x32xf32> to vector<8x1x32xf32>
    %3 = vector.broadcast %2 : vector<8x1x32xf32> to vector<8x2x32xf32>
    %4 = arith.addf %0, %3 : vector<8x2x32xf32>
    %c0_4 = arith.constant 0 : index
    %c0_5 = arith.constant 0 : index
    %c0_6 = arith.constant 0 : index
    %5 = vector.load %arg3[%c0_4, %c0_5, %c0_6] : memref<8x2x32xf32, #tpu.memory_space<vmem>>, vector<8x2x32xf32>
    tpu.vector_store %arg3[%c0_4, %c0_5, %c0_6], %4 {strides = array<i32>} : memref<8x2x32xf32, #tpu.memory_space<vmem>>, vector<8x2x32xf32>,
    return
  }
  func.func @transform_0(%arg0: i32) -> (i32, i32, i32) {
    %c0_i32 = arith.constant 0 : i32
    %c0_i32_0 = arith.constant 0 : i32
    %c0_i32_1 = arith.constant 0 : i32
    return %arg0, %c0_i32, %c0_i32_0 : i32, i32, i32
  }
  func.func @transform_1(%arg0: i32) -> (i32, i32) {
    %c0_i32 = arith.constant 0 : i32
    %c0_i32_0 = arith.constant 0 : i32
    return %arg0, %c0_i32 : i32, i32
  }
  func.func @transform_2(%arg0: i32) -> (i32, i32, i32) {
    %c0_i32 = arith.constant 0 : i32
    %c0_i32_0 = arith.constant 0 : i32
    %c0_i32_1 = arith.constant 0 : i32
    return %arg0, %c0_i32, %c0_i32_0 : i32, i32, i32
  }
}

</mosaic_0001>

<bundles_post_ra>
// kernel: tpu_custom_call.1
= control target key start
LH: loop header
LB: loop body
LE: loop exit
PB: predicated region body
PF: predicated region fallthrough
CT: control target
= control target key end

     0   :  { %vm53_vm0 = vcmask 254976   ;;  %s165_s0 = inlined_call_operand.vmem [shape: f32[8,2,32], index: 0, kind: input, shape index: {}]   ;;  %s166_s1 = inlined_call_operand.vmem [shape: f32[64,32], index: 1, kind: input, shape index: {}]   ;;  %s167_s2 = inlined_call_operand.hbm [shape: f32[8,2,32], index: 2, kind: output, shape index: {}]  }
   0x1   :  { %v12_v0 = vld [vmem:[%s165_s0] sm:$0x3]  ;;  %v13_v2 = vld [vmem:[%s165_s0 + $0x2] sm:$0x3]  ;;  %v14_v5 = vld [vmem:[%s165_s0 + $0x4] sm:$0x3] }
   0x2   :  { %v20_v1 = vld [vmem:[%s166_s1] sm:$0xff]  ;;  %v16_v9 = vld [vmem:[%s165_s0 + $0x8] sm:$0x3]  ;;  %v17_v16 = vld [vmem:[%s165_s0 + $0xa] sm:$0x3] }
   0x3   :  { %v29_v3 = vperm.slane %v20_v1, 0  ;;  %v22_v4 = vrot.slane %v20_v1, 1  ;;  %v23_v6 = vrot.slane %v20_v1, 2  ;;  %v24_v7 = vrot.slane %v20_v1, 3  ;;  %v15_v8 = vld [vmem:[%s165_s0 + $0x6] sm:$0x3] }
   0x4   :  { %v25_v10 = vrot.slane %v20_v1, 4  ;;  %v26_v11 = vrot.slane %v20_v1, 5  ;;  %v27_v19 = vrot.slane %v20_v1, 6  ;;  %v28_v20 = vrot.slane %v20_v1, 7  ;;  %v18_v24 = vld [vmem:[%s165_s0 + $0xc] sm:$0x3] }
   0x5   :  { %v45_v12 = vadd.f32 %v29_v3, %v12_v0  ;;  %v30_v13 = vperm.slane %v22_v4, 0  ;;  %v31_v14 = vperm.slane %v23_v6, 0  ;;  %v32_v15 = vperm.slane %v24_v7, 0 }
   0x6   :  { %v33_v17 = vperm.slane %v25_v10, 0  ;;  %v34_v18 = vperm.slane %v26_v11, 0 }
   0x7   :  { %54 = vst.msk [vmem:[#allocation2] sm:$0x3] %vm53_vm0, %v45_v12  ;;  %v46_v21 = vadd.f32 %v30_v13, %v13_v2  ;;  %v47_v22 = vadd.f32 %v31_v14, %v14_v5  ;;  %v48_v23 = vadd.f32 %v32_v15, %v15_v8 }
   0x8   :  { %7 = vsyncpa [#allocation3], 0  ;;  %v49_v25 = vadd.f32 %v33_v17, %v16_v9  ;;  %v35_v26 = vperm.slane %v27_v19, 0  ;;  %v19_v27 = vld [vmem:[%s165_s0 + $0xe] sm:$0x3]  ;;  %v36_v28 = vperm.slane %v28_v20, 0  ;;  %v50_v29 = vadd.f32 %v34_v18, %v17_v16 }
   0x9   :  { %55 = vst.msk [vmem:[#allocation2 + $0x2] sm:$0x3] %vm53_vm0, %v46_v21  ;;  %s109_s26 = smov [#allocation2]   ;;  %s68_s30 = sshll.u32 %s167_s2, 4  ;;  %s69_s30 = int_to_ptr.hbm [resolvable:$true] %s68_s30 }
   0xa   :  { %s66_s27 = sshll.u32 %s109_s26, 4  ;;  %56 = vst.msk [vmem:[#allocation2 + $0x4] sm:$0x3] %vm53_vm0, %v47_v22  ;;  %v51_v30 = vadd.f32 %v35_v26, %v18_v24  ;;  %v52_v31 = vadd.f32 %v36_v28, %v19_v27  ;;  %s110_s0 = smov 32   ;;  %s67_s27 = int_to_ptr.vmem [resolvable:$true] %s66_s27 }
   0xb   :  { %57 = vst.msk [vmem:[#allocation2 + $0x6] sm:$0x3] %vm53_vm0, %v48_v23  ;;  %s111_s3 = smov 2  }
   0xc   :  { %58 = vst.msk [vmem:[#allocation2 + $0x8] sm:$0x3] %vm53_vm0, %v49_v25 }
   0xd   :  { %59 = vst.msk [vmem:[#allocation2 + $0xa] sm:$0x3] %vm53_vm0, %v50_v29 }
   0xe   :  { %60 = vst.msk [vmem:[#allocation2 + $0xc] sm:$0x3] %vm53_vm0, %v51_v30 }
   0xf   :  { %61 = vst.msk [vmem:[#allocation2 + $0xe] sm:$0x3] %vm53_vm0, %v52_v31 }
  0x10   :  { %74 = dma.vmem_to_hbm [thread:$0]  %s67_s27, 256, %s69_s30, [#allocation3], %s110_s0, %s110_s0, %s111_s3  }
  0x11   :  { %107 = dma.done.wait [#allocation3], 256  }
  0x12   :  { %108 = vsyncadd [#allocation3], 4294967040 }
  0x13   :  { %79 = vsyncpa [#allocation3], 1 }

</bundles_post_ra>
